<compile_context>
chip_gen: v6e
topology: v6e:2x2x1
jax: 0.10.0
libtpu: 0.0.40
codegen_flags: <defaults>
</compile_context>

<pallas_src>
import functools

import jax
import jax.numpy as jnp
from jax.experimental import pallas as pl
from jax.experimental.pallas import tpu as pltpu


# ---------------------------------------------------------------------------
# Kernels
# ---------------------------------------------------------------------------

def _patchify_kernel_nonoverlap(x_ref, o_ref, *, rows):
    # x_ref: (1, T, tc) block, o_ref: (1, tc, rows) with rows = P*L == covered T.
    # Non-overlapping patches: output slab is just the transpose of the first
    # `rows` time steps.  One XLU transpose, one unmasked lane-dense store.
    o_ref[0] = x_ref[0, :rows, :].T


def _patchify_kernel_overlap(x_ref, o_ref, *, patch_length, patch_stride,
                             num_patches):
    # x_ref: (1, T, tc) block, o_ref: (1, tc, P*L) lane-dense output slab.
    L, S, P = patch_length, patch_stride, num_patches
    xt = x_ref[0].T                      # (tc, T) -- single XLU transpose per tile
    # Store each (tc, L) window directly into the output block: every slice's
    # live range ends at its store (no P-wide concatenate kept live), and the
    # outbound HBM DMA is still one lane-dense (tc, P*L) block.
    for p in range(P):
        o_ref[0, :, p * L:(p + 1) * L] = xt[:, p * S:p * S + L]


# ---------------------------------------------------------------------------
# Wrapper
# ---------------------------------------------------------------------------

def _vmem_capacity_bytes():
    try:
        return int(pltpu.get_tpu_info().vmem_capacity_bytes)
    except Exception:
        return 64 << 20  # conservative fallback (v7x physical VMEM)


def _choose_tc(B, T, C, PL, itemsize, blk_budget):
    """Largest legal channel tile under the double-buffered byte budget."""
    if C % 128 != 0:
        # Full-dim blocks are always legal regardless of the (8,128) rule.
        return C
    per_c_bytes = (T + PL) * itemsize          # in-block + out-block bytes / channel
    tc, cand = 128, 128
    while cand <= C:
        if C % cand == 0 and 2 * cand * per_c_bytes <= blk_budget:
            tc = cand
        cand += 128
    # v7x megacore: make sure small-batch shapes still yield >= 2 parallel
    # grid steps so both TensorCores get work (no effect on v5e/v6e).
    if B == 1 and C // tc < 2 and C >= 256:
        cand = (C // 2) // 128 * 128
        while cand >= 128:
            if C % cand == 0:
                tc = cand
                break
            cand -= 128
    return tc


def patchify(x, patch_length, patch_stride):
    """x: (B, T, C) -> (B, C, P, L); matches unfold(dim=1, L, S).transpose(1, 2)."""
    B, T, C = x.shape
    L, S = patch_length, patch_stride
    assert S > 0, "patch_stride must be positive"
    assert T >= L, "sequence shorter than patch_length"
    P = (T - L) // S + 1
    PL = P * L

    itemsize = jnp.dtype(x.dtype).itemsize
    capacity = _vmem_capacity_bytes()
    # Budget for the double-buffered in/out blocks: ~3/8 of physical VMEM
    # (48 MiB on 128 MiB v5e/v6e, 24 MiB on 64 MiB v7x) -> headroom for
    # compiler scratch regardless of generation.
    blk_budget = (capacity * 3) // 8

    tc = _choose_tc(B, T, C, PL, itemsize, blk_budget)

    blk_bytes = (T * tc + tc * PL) * itemsize       # one in-block + one out-block
    required = 2 * blk_bytes                         # double buffered
    vmem_limit = max(required + (2 << 20), 16 << 20)
    vmem_limit = min(vmem_limit, capacity)
    vmem_limit = int(max(vmem_limit, required))      # never below the requirement

    if S == L:
        kernel = functools.partial(_patchify_kernel_nonoverlap, rows=PL)
    else:
        kernel = functools.partial(
            _patchify_kernel_overlap,
            patch_length=L, patch_stride=S, num_patches=P,
        )

    out_flat = pl.pallas_call(
        kernel,
        out_shape=jax.ShapeDtypeStruct((B, C, PL), x.dtype),
        grid_spec=pltpu.PrefetchScalarGridSpec(
            num_scalar_prefetch=0,
            grid=(B, C // tc),
            in_specs=[pl.BlockSpec((1, T, tc), lambda b, cb: (b, 0, cb))],
            out_specs=pl.BlockSpec((1, tc, PL), lambda b, cb: (b, cb, 0)),
        ),
        compiler_params=pltpu.CompilerParams(
            dimension_semantics=("parallel", "parallel"),
            vmem_limit_bytes=vmem_limit,
        ),
    )(x)

    # Free metadata reshape: split the lane-dense P*L slab back into (P, L).
    return out_flat.reshape(B, C, P, L)


# ---------------------------------------------------------------------------
# Reference + test
# ---------------------------------------------------------------------------

def _reference(x, L, S):
    T = x.shape[1]
    P = (T - L) // S + 1
    # unfold(dim=1, L, S) -> (B, P, C, L); transpose(1, 2) -> (B, C, P, L)
    ref = jnp.stack([x[:, p * S:p * S + L, :] for p in range(P)], axis=1)  # (B,P,L,C)
    return jnp.transpose(ref, (0, 3, 1, 2))                                # (B,C,P,L)


if __name__ == "__main__":
    key = jax.random.PRNGKey(0)

    # --- overlapping-patch path (S < L) ---
    B, T, C = 2, 16, 4
    L, S = 8, 4                         # -> P = 3
    x = jax.random.normal(key, (B, T, C), dtype=jnp.float32)
    out = jax.block_until_ready(patchify(x, L, S))
    P = (T - L) // S + 1
    assert out.shape == (B, C, P, L), out.shape
    assert jnp.array_equal(out, _reference(x, L, S)), "overlap path mismatch"

    # --- non-overlapping fast path (S == L) ---
    L2 = S2 = 4                         # -> P = 4
    out2 = jax.block_until_ready(patchify(x, L2, S2))
    P2 = (T - L2) // S2 + 1
    assert out2.shape == (B, C, P2, L2), out2.shape
    assert jnp.array_equal(out2, _reference(x, L2, S2)), "fast path mismatch"

    print("KERNEL_OK")
</pallas_src>

<mosaic_0001>
module attributes {stable_mosaic.version = 11 : i64} {
  func.func @_patchify_kernel_overlap(%arg0: i32, %arg1: i32, %arg2: memref<1x16x4xf32, #tpu.memory_space<vmem>>, %arg3: memref<1x4x24xf32, #tpu.memory_space<vmem>>) attributes {dimension_semantics = [#tpu.dimension_semantics<parallel>, #tpu.dimension_semantics<parallel>], iteration_bounds = array<i64: 2, 1>, scalar_prefetch = 0 : i64, scratch_operands = 0 : i64, tpu.core_type = #tpu.core_type<tc>, window_params = [{transform_indices = @transform_0, window_bounds = array<i64: 1, 16, 4>}, {transform_indices = @transform_1, window_bounds = array<i64: 1, 4, 24>}]} {
    %c0 = arith.constant 0 : index
    %c0_0 = arith.constant 0 : index
    %c0_1 = arith.constant 0 : index
    %0 = vector.load %arg2[%c0, %c0_0, %c0_1] : memref<1x16x4xf32, #tpu.memory_space<vmem>>, vector<1x16x4xf32>
    %1 = vector.shape_cast %0 : vector<1x16x4xf32> to vector<16x4xf32>
    %2 = tpu.transpose %1, [1, 0] : vector<16x4xf32> -> vector<4x16xf32>
    %3 = vector.extract_strided_slice %2 {offsets = [0, 0], sizes = [4, 8], strides = [1, 1]} : vector<4x16xf32> to vector<4x8xf32>
    %c0_2 = arith.constant 0 : index
    %c0_3 = arith.constant 0 : index
    %c0_4 = arith.constant 0 : index
    %4 = vector.load %arg3[%c0_2, %c0_3, %c0_4] : memref<1x4x24xf32, #tpu.memory_space<vmem>>, vector<1x4x8xf32>
    %5 = vector.shape_cast %4 : vector<1x4x8xf32> to vector<4x8xf32>
    %6 = vector.shape_cast %3 : vector<4x8xf32> to vector<1x4x8xf32>
    tpu.vector_store %arg3[%c0_2, %c0_3, %c0_4], %6 {strides = array<i32>} : memref<1x4x24xf32, #tpu.memory_space<vmem>>, vector<1x4x8xf32>,
    %7 = vector.extract_strided_slice %2 {offsets = [0, 4], sizes = [4, 8], strides = [1, 1]} : vector<4x16xf32> to vector<4x8xf32>
    %c0_5 = arith.constant 0 : index
    %c0_6 = arith.constant 0 : index
    %c8 = arith.constant 8 : index
    %8 = vector.load %arg3[%c0_5, %c0_6, %c8] : memref<1x4x24xf32, #tpu.memory_space<vmem>>, vector<1x4x8xf32>
    %9 = vector.shape_cast %8 : vector<1x4x8xf32> to vector<4x8xf32>
    %10 = vector.shape_cast %7 : vector<4x8xf32> to vector<1x4x8xf32>
    tpu.vector_store %arg3[%c0_5, %c0_6, %c8], %10 {strides = array<i32>} : memref<1x4x24xf32, #tpu.memory_space<vmem>>, vector<1x4x8xf32>,
    %11 = vector.extract_strided_slice %2 {offsets = [0, 8], sizes = [4, 8], strides = [1, 1]} : vector<4x16xf32> to vector<4x8xf32>
    %c0_7 = arith.constant 0 : index
    %c0_8 = arith.constant 0 : index
    %c16 = arith.constant 16 : index
    %12 = vector.load %arg3[%c0_7, %c0_8, %c16] : memref<1x4x24xf32, #tpu.memory_space<vmem>>, vector<1x4x8xf32>
    %13 = vector.shape_cast %12 : vector<1x4x8xf32> to vector<4x8xf32>
    %14 = vector.shape_cast %11 : vector<4x8xf32> to vector<1x4x8xf32>
    tpu.vector_store %arg3[%c0_7, %c0_8, %c16], %14 {strides = array<i32>} : memref<1x4x24xf32, #tpu.memory_space<vmem>>, vector<1x4x8xf32>,
    return
  }
  func.func @transform_0(%arg0: i32, %arg1: i32) -> (i32, i32, i32) {
    %c0_i32 = arith.constant 0 : i32
    %c0_i32_0 = arith.constant 0 : i32
    return %arg0, %c0_i32, %arg1 : i32, i32, i32
  }
  func.func @transform_1(%arg0: i32, %arg1: i32) -> (i32, i32, i32) {
    %c0_i32 = arith.constant 0 : i32
    %c0_i32_0 = arith.constant 0 : i32
    return %arg0, %arg1, %c0_i32 : i32, i32, i32
  }
}

</mosaic_0001>

<bundles_post_ra>
// kernel: tpu_custom_call.1
= control target key start
LH: loop header
LB: loop body
LE: loop exit
PB: predicated region body
PF: predicated region fallthrough
CT: control target
= control target key end

     0   :  { %6 = vsyncpa [#allocation3], 0  ;;  %s543_s0 = inlined_call_operand.vmem [shape: f32[2,16,4], index: 0, kind: input, shape index: {}]   ;;  %s544_s1 = inlined_call_operand.hbm [shape: f32[2,4,24], index: 1, kind: output, shape index: {}]  }
   0x1   :  { %8 = vsyncpa [#allocation3 + $0x1], 0  ;;  %s438_s6 = smov 0   ;;  %s440_s7 = smov 0  }
   0x2   :  { %s442_s8 = smov 0   ;;  %s444_s9 = smov 0  }
   0x3   :  { %s446_s10 = smov 0   ;;  %s448_s11 = smov 0  }
   0x4 LB: > { %s276_s12 = sadd.s32 4294967295, %s423_s11   ;;  %s277_s13 = sadd.s32 4294967294, %s423_s11   ;;  %s423_s11 = sphi %s448_s11, %s14_s11   ;;  %s419_s10 = sphi %s446_s10, %s551_s10   ;;  %s415_s9 = sphi %s444_s9, %s550_s9   ;;  %s411_s8 = sphi %s442_s8, %s549_s8   ;;  %s407_s7 = sphi %s440_s7, %s548_s7   ;;  %s403_s6 = sphi %s438_s6, %s547_s6  }
   0x5   : > { %s26_s14 = sadd.s32 1, %s419_s10  ;;  %s63_s15 = sadd.s32 1, %s411_s8 }
   0x6   : > { %p28_p0 = scmp.ge.s32.totalorder %s26_s14, 2  ;;  %p73_p1 = scmp.ne.s32.totalorder %s411_s8, %s407_s7 }
   0x7   : > { %p74_p2 = scmp.eq.s32.totalorder %s276_s12, 1  ;;  %p79_p3 = scmp.ne.s32.totalorder %s407_s7, %s403_s6 }
   0x8   : > { %s553_s14 = smov (%p28_p0, %s26_s14), 0  ;;  %p80_p5 = scmp.eq.s32.totalorder %s277_s13, 1 }
   0x9   : > { %p478_p4 = por %p74_p2, %p73_p1  ;;  %s58_s17 = ssub.s32 %s419_s10, %s553_s14 }
   0xa   : > { %p280_p6 = scmp.ge.s32.totalorder %s423_s11, 1  ;;  %p61_p7 = scmp.eq.s32.totalorder %s58_s17, 0 }
   0xb   : > { %p485_p8 = por %p80_p5, %p79_p3  ;;  %p109_p9 = scmp.lt.s32.totalorder %s423_s11, 3 }
   0xc   : > { %s491_s19 = scalar_select %p61_p7, %s411_s8, %s63_s15  }
   0xd   : > { %p110_p10 = pnand %p280_p6, %p109_p9 }
   0xe   : > { %p132_p11 = scmp.lt.s32.totalorder (!%p110_p10), %s415_s9, 1  ;;  %s129_s25 = sand.u32 (!%p110_p10), 1, %s407_s7  }
   0xf   : > { %113 = sbr.rel (%p110_p10) target bundleno = 282 (0x11a), region = 24  ;;  %s281_s26 = sshll.u32 (!%p110_p10), %s129_s25, 2 }
  0x10   : > { %s131_s27 = scalar_lea.vmem (!%p110_p10), [#allocation2], %s281_s26  ;;  %s425_s28 = smov (!%p110_p10), 4  }
  0x11   : > { %s426_s29 = smov (!%p110_p10), 8   ;;  %s285_s30 = sshll.u32 (!%p110_p10), %s415_s9, 6 }
  0x12   : > { %s202_s2 = sshll.u32 (!%p110_p10), %s131_s27, 4  ;;  %s503_s5 = scalar_lea.hbm (!%p110_p10), %s544_s1, %s285_s30  ;;  %s203_s2 = int_to_ptr.vmem [resolvable:$true] %s202_s2 }
  0x13   : > { %s188_s12 = scalar_lea.sflag (!%p110_p10), [#allocation3], %s129_s25  ;;  %s347_s13 = scalar_lea.vmem (!%p110_p10), %s203_s2, 64 }
  0x14   : > { %s133_s20 = scalar_select %p132_p11, %s415_s9, 1  ;;  %vm174_vm0 = vcmask 60416   ;;  %vm180_vm1 = vcmask 126016   ;;  %vm185_vm2 = vcmask 191616  }
  0x15   : > { %p348_p12 = scmp.ne.s32.totalorder %s203_s2, %s347_s13  ;;  %s427_s15 = smov [#allocation2]  }
  0x16   : > { %s288_s21 = sshll.u32 %s133_s20, 4  ;;  %s351_s17 = sshll.u32 %s427_s15, 4  ;;  %s352_s17 = int_to_ptr.vmem [resolvable:$false] %s351_s17 }
  0x17   : > { %s139_s24 = scalar_lea.vmem %s543_s0, %s288_s21  ;;  %p349_p13 = pnand %p348_p12, %p478_p4 }
  0x18   : > { %v140_v0 = vld [vmem:[%s139_s24] sm:$0xff]  ;;  %v141_v1 = vld [vmem:[%s139_s24 + $0x8] sm:$0xff]  ;;  %s353_s9 = scalar_lea.vmem %s352_s17, 128  ;;  %p354_p1 = scmp.lt.s32.totalorder %s203_s2, %s352_s17 }
  0x19   : > { %142 = vxpose.xlu0.b32.start [1/2] (short) (narrow) %v140_v0, 8  ;;  %p350_p0 = pneg %p349_p13  ;;  %p355_p2 = scmp.lt.s32.totalorder %s353_s9, %s347_s13 }
  0x1b   : > { %p356_p3 = por %p355_p2, %p354_p1 }
  0x1d   : > { %143 = vxpose.xlu0.b32.end [2/2] (short) (narrow) %v141_v1, 8  ;;  %p357_p5 = pnand %p356_p3, %p350_p0 }
  0x95   : > { %v158_v2 = vpop.trf.xlu0 }
  0x96   : > { %175 = vst.msk [vmem:[%s131_s27] sm:$0xf] %vm174_vm0, %v158_v2  ;;  %177 = vrot.lane.b32.xlu1 %v158_v2, %s425_s28 }
  0x9a   : > { %182 = vrot.lane.b32.xlu1 %v158_v2, %s426_s29 }
 0x108   : > { %v178_v3 = vpop.permute.xlu1 %177 }
 0x109   : > { %181 = vst.msk [vmem:[%s131_s27] sm:$0xf] %vm180_vm1, %v178_v3 }
 0x10c   : > { %v183_v4 = vpop.permute.xlu1 %182 }
 0x10d   : > { %186 = vst.msk [vmem:[%s131_s27] sm:$0xf] %vm185_vm2, %v183_v4 }
 0x10e   : > { %360 = shalt.err (!%p357_p5)
}
 0x10f   : > { %s361_s20 = scalar_lea.hbm %s503_s5, 64  ;;  %s365_s23 = scalar_lea.hbm %s544_s1, 128 }
 0x110   : > { %p362_p6 = scmp.ne.s32.totalorder %s503_s5, %s361_s20  ;;  %p366_p10 = scmp.lt.s32.totalorder %s503_s5, %s544_s1 }
 0x111   : > { %p367_p11 = scmp.lt.s32.totalorder %s365_s23, %s361_s20 }
 0x112   : > { %p363_p7 = pnand %p362_p6, %p478_p4 }
 0x113   : > { %p368_p12 = por %p367_p11, %p366_p10 }
 0x114   : > { %p364_p9 = pneg %p363_p7 }
 0x116   : > { %p369_p13 = pnand %p368_p12, %p364_p9 }
 0x118   : > { %372 = shalt.err (!%p369_p13)
}
 0x119   : > { %289 = dma.vmem_to_hbm [thread:$0]  (%p478_p4), %s203_s2, 64, %s503_s5, %s188_s12  }
 0x11a PF: > { %p295_p0 = scmp.ge.s32.totalorder %s423_s11, 2  ;;  %s214_s26 = sand.u32 1, %s403_s6  }
 0x11b   : > { %s215_s27 = scalar_lea.sflag [#allocation3], %s214_s26 }
 0x11c   : > { %p292_p1 = pnand %p295_p0, %p485_p8 }
 0x11e   : > { %p293_p2 = pneg %p292_p1 }
 0x120   : > { %398 = dma.done.wait (%p293_p2), %s215_s27, 64  }
 0x121   : > { %400 = vsyncadd (%p293_p2), %s215_s27, 4294967232  ;;  %s14_s11 = sadd.s32 1, %s423_s11   ;;  %s547_s6 = smov %s407_s7 }
 0x122   : > { %p11_p3 = scmp.ge.s32.totalorder %s14_s11, 4   ;;  %s548_s7 = smov %s411_s8 }
 0x123   : > { %s549_s8 = smov %s491_s19  ;;  %s550_s9 = smov %s419_s10 }
 0x124   : > { %s551_s10 = smov %s553_s14  ;;  %13 = sbr.rel (!%p11_p3) target bundleno = 4 (0x4), region = 59 }
 0x129   :  { %220 = vsyncpa [#allocation3], 1 }
 0x12a   :  { %222 = vsyncpa [#allocation3 + $0x1], 1 }

</bundles_post_ra>
